<compile_context>
chip_gen: v6e
topology: v6e:2x2x1
jax: 0.10.0
libtpu: 0.0.40
codegen_flags: <defaults>
</compile_context>

<pallas_src>
import math

import jax
import jax.numpy as jnp
from jax import lax
from jax.experimental import pallas as pl
from jax.experimental.pallas import tpu as pltpu


def _make_attention_kernel(batch, sq, skv, with_attn):
    """Builds the fused projection + attention kernel for static (B, Sq, Skv)."""

    def kernel(q2d_ref, k2d_ref, v_ref, wq_ref, bq_ref, wk_ref, bk_ref,
               *out_refs):
        out_ref = out_refs[0]
        attn_ref = out_refs[1] if with_attn else None

        # One fused projection matmul per operand over the flattened (B*S)
        # rows.  1/sqrt(d_k) is already folded into wq/bq by the wrapper, so
        # the scores come out pre-scaled.
        q_all = jnp.dot(q2d_ref[...], wq_ref[...],
                        preferred_element_type=jnp.float32) + bq_ref[...]
        k_all = jnp.dot(k2d_ref[...], wk_ref[...],
                        preferred_element_type=jnp.float32) + bk_ref[...]

        # Static unroll over the (tiny) batch for scores / softmax / PV.
        for b in range(batch):
            qb = q_all[b * sq:(b + 1) * sq, :]       # (Sq, E)  f32
            kb = k_all[b * skv:(b + 1) * skv, :]     # (Skv, E) f32

            # Q @ K^T without an explicit transpose of K: contract the last
            # axis of both operands directly on the MXU.
            scores = lax.dot_general(
                qb, kb, (((1,), (1,)), ((), ())),
                preferred_element_type=jnp.float32)  # (Sq, Skv), pre-scaled

            # Numerically stable softmax, strictly in f32.
            m = jnp.max(scores, axis=-1, keepdims=True)
            p = jnp.exp(scores - m)
            denom = jnp.sum(p, axis=-1, keepdims=True)
            w = p * pl.reciprocal(denom, approx=True)   # EUP vrcp (free slot)

            out_ref[b] = jnp.dot(
                w.astype(v_ref.dtype), v_ref[b],
                preferred_element_type=jnp.float32).astype(out_ref.dtype)
            if attn_ref is not None:
                attn_ref[b] = w.astype(attn_ref.dtype)

    return kernel


def single_head_attention(queries, keys, values, wq, bq, wk, bk, *,
                          return_attn_weights=True,
                          compute_dtype=jnp.float32):
    """queries: [B,Sq,Dq]  keys: [B,Skv,Dkv]  values: [B,Skv,Ev]
       wq: [E,Dq] (PyTorch Linear layout (out,in))  bq: [E]
       wk: [E,Dkv]                                  bk: [E]
       compute_dtype: MXU operand dtype (jnp.bfloat16 is worthwhile on
       v6e/v7x at real shapes; softmax stays f32 either way).
    Returns (attention_output [B,Sq,Ev], attention_weights [B,Sq,Skv] | None).
    """
    B, Sq, Dq = queries.shape
    _, Skv, Dkv = keys.shape
    E = wq.shape[0]
    Ev = values.shape[-1]

    # d_k in the module is K.shape[-1] after projection, i.e. embed_dim = E.
    scale = 1.0 / math.sqrt(float(E))

    # Pre-transpose weights to (in, out) and fold the score scale into the
    # query projection (weights + bias) so the kernel never scales scores.
    wq_t = (jnp.asarray(wq, jnp.float32).T * scale).astype(compute_dtype)
    wk_t = jnp.asarray(wk, jnp.float32).T.astype(compute_dtype)
    bq2 = (jnp.asarray(bq, jnp.float32) * scale).reshape(1, E)   # f32 bias
    bk2 = jnp.asarray(bk, jnp.float32).reshape(1, E)             # f32 bias

    # Flatten batch*seq so each projection is a single MXU matmul for the
    # whole batch (bigger sublane extent, one grid step).
    q2d = queries.reshape(B * Sq, Dq).astype(compute_dtype)
    k2d = keys.reshape(B * Skv, Dkv).astype(compute_dtype)
    v = values.astype(compute_dtype)

    out_shapes = [jax.ShapeDtypeStruct((B, Sq, Ev), jnp.float32)]
    out_specs = [pl.BlockSpec((B, Sq, Ev), lambda i: (0, 0, 0))]
    if return_attn_weights:
        out_shapes.append(jax.ShapeDtypeStruct((B, Sq, Skv), jnp.float32))
        out_specs.append(pl.BlockSpec((B, Sq, Skv), lambda i: (0, 0, 0)))

    # Advisory cost estimate for XLA's scheduler.
    itemsize = jnp.dtype(compute_dtype).itemsize
    flops = 2 * B * (Sq * Dq * E + Skv * Dkv * E + Sq * Skv * E + Sq * Skv * Ev)
    transcendentals = B * Sq * Skv + B * Sq          # exp + reciprocal
    bytes_accessed = (
        (B * Sq * Dq + B * Skv * Dkv + B * Skv * Ev
         + Dq * E + Dkv * E) * itemsize
        + 2 * E * 4                                   # biases (f32)
        + B * Sq * Ev * 4                             # output (f32)
        + (B * Sq * Skv * 4 if return_attn_weights else 0))

    grid_spec = pltpu.PrefetchScalarGridSpec(
        num_scalar_prefetch=0,
        grid=(1,),   # single step: all operands fit VMEM at these shapes
        in_specs=[
            pl.BlockSpec((B * Sq, Dq), lambda i: (0, 0)),
            pl.BlockSpec((B * Skv, Dkv), lambda i: (0, 0)),
            pl.BlockSpec((B, Skv, Ev), lambda i: (0, 0, 0)),
            pl.BlockSpec((Dq, E), lambda i: (0, 0)),
            pl.BlockSpec((1, E), lambda i: (0, 0)),
            pl.BlockSpec((Dkv, E), lambda i: (0, 0)),
            pl.BlockSpec((1, E), lambda i: (0, 0)),
        ],
        out_specs=out_specs,
    )

    kernel = _make_attention_kernel(B, Sq, Skv, return_attn_weights)

    results = pl.pallas_call(
        kernel,
        out_shape=tuple(out_shapes),
        grid_spec=grid_spec,
        compiler_params=pltpu.CompilerParams(
            dimension_semantics=("arbitrary",)),
        cost_estimate=pl.CostEstimate(
            flops=flops,
            transcendentals=transcendentals,
            bytes_accessed=bytes_accessed),
    )(q2d, k2d, v, wq_t, bq2, wk_t, bk2)

    if return_attn_weights:
        return results[0], results[1]
    return results[0], None


def _reference(queries, keys, values, wq, bq, wk, bk):
    Q = queries @ wq.T + bq
    K = keys @ wk.T + bk
    d_k = K.shape[-1]
    scores = jnp.einsum("bqe,bke->bqk", Q, K) / jnp.sqrt(jnp.float32(d_k))
    w = jax.nn.softmax(scores, axis=-1)
    out = jnp.einsum("bqk,bke->bqe", w, values)
    return out, w


if __name__ == "__main__":
    # Small shapes consistent with the module's forward.
    B, Sq, Skv = 2, 8, 8
    q_embed_dim, kv_embed_dim, embed_dim = 32, 32, 32

    key = jax.random.PRNGKey(0)
    k1, k2, k3, k4, k5, k6, k7 = jax.random.split(key, 7)

    queries = jax.random.normal(k1, (B, Sq, q_embed_dim), jnp.float32)
    keys = jax.random.normal(k2, (B, Skv, kv_embed_dim), jnp.float32)
    values = jax.random.normal(k3, (B, Skv, embed_dim), jnp.float32)

    # PyTorch Linear layout: W is (out, in).
    wq = jax.random.normal(k4, (embed_dim, q_embed_dim), jnp.float32) * 0.1
    bq = jax.random.normal(k5, (embed_dim,), jnp.float32) * 0.1
    wk = jax.random.normal(k6, (embed_dim, kv_embed_dim), jnp.float32) * 0.1
    bk = jax.random.normal(k7, (embed_dim,), jnp.float32) * 0.1

    out, attn_w = single_head_attention(queries, keys, values, wq, bq, wk, bk)
    jax.block_until_ready((out, attn_w))

    # Verify against a pure-JAX reference.  Tolerance is slightly looser than
    # exact because the softmax denominator uses the EUP approximate
    # reciprocal (still far tighter than any structural bug would produce).
    ref_out, ref_w = _reference(queries, keys, values, wq, bq, wk, bk)
    assert jnp.allclose(out, ref_out, atol=5e-3, rtol=5e-3)
    assert jnp.allclose(attn_w, ref_w, atol=5e-3, rtol=5e-3)

    # Also exercise the "no attention weights" fast path (halves HBM
    # writeback, drops the lane-sparse Skv-wide store).
    out_only, none_w = single_head_attention(
        queries, keys, values, wq, bq, wk, bk, return_attn_weights=False)
    jax.block_until_ready(out_only)
    assert none_w is None
    assert jnp.allclose(out_only, ref_out, atol=5e-3, rtol=5e-3)

    print("KERNEL_OK")
</pallas_src>

<mosaic_0001>
module attributes {stable_mosaic.version = 11 : i64} {
  func.func @kernel(%arg0: i32, %arg1: memref<16x32xf32, #tpu.memory_space<vmem>>, %arg2: memref<16x32xf32, #tpu.memory_space<vmem>>, %arg3: memref<2x8x32xf32, #tpu.memory_space<vmem>>, %arg4: memref<32x32xf32, #tpu.memory_space<vmem>>, %arg5: memref<1x32xf32, #tpu.memory_space<vmem>>, %arg6: memref<32x32xf32, #tpu.memory_space<vmem>>, %arg7: memref<1x32xf32, #tpu.memory_space<vmem>>, %arg8: memref<2x8x32xf32, #tpu.memory_space<vmem>>, %arg9: memref<2x8x8xf32, #tpu.memory_space<vmem>>) attributes {dimension_semantics = [#tpu.dimension_semantics<arbitrary>], iteration_bounds = array<i64: 1>, scalar_prefetch = 0 : i64, scratch_operands = 0 : i64, tpu.core_type = #tpu.core_type<tc>, window_params = [{pipeline_mode = #tpu.pipeline_mode<synchronous>, transform_indices = @transform_0, window_bounds = array<i64: 16, 32>}, {pipeline_mode = #tpu.pipeline_mode<synchronous>, transform_indices = @transform_1, window_bounds = array<i64: 16, 32>}, {pipeline_mode = #tpu.pipeline_mode<synchronous>, transform_indices = @transform_2, window_bounds = array<i64: 2, 8, 32>}, {pipeline_mode = #tpu.pipeline_mode<synchronous>, transform_indices = @transform_3, window_bounds = array<i64: 32, 32>}, {pipeline_mode = #tpu.pipeline_mode<synchronous>, transform_indices = @transform_4, window_bounds = array<i64: 1, 32>}, {pipeline_mode = #tpu.pipeline_mode<synchronous>, transform_indices = @transform_5, window_bounds = array<i64: 32, 32>}, {pipeline_mode = #tpu.pipeline_mode<synchronous>, transform_indices = @transform_6, window_bounds = array<i64: 1, 32>}, {pipeline_mode = #tpu.pipeline_mode<synchronous>, transform_indices = @transform_7, window_bounds = array<i64: 2, 8, 32>}, {pipeline_mode = #tpu.pipeline_mode<synchronous>, transform_indices = @transform_8, window_bounds = array<i64: 2, 8, 8>}]} {
    %c0 = arith.constant 0 : index
    %c0_0 = arith.constant 0 : index
    %0 = vector.load %arg1[%c0, %c0_0] : memref<16x32xf32, #tpu.memory_space<vmem>>, vector<16x32xf32>
    %c0_1 = arith.constant 0 : index
    %c0_2 = arith.constant 0 : index
    %1 = vector.load %arg4[%c0_1, %c0_2] : memref<32x32xf32, #tpu.memory_space<vmem>>, vector<32x32xf32>
    %cst = arith.constant dense<0.000000e+00> : vector<16x32xf32>
    %2 = tpu.matmul %0, %1, %cst {dimension_numbers = #tpu.dot_dimension_numbers<[1], [0], [0], [1], [0, 0, 1, 1], [], []>} : vector<16x32xf32>, vector<32x32xf32>, vector<16x32xf32> -> vector<16x32xf32>
    %c0_3 = arith.constant 0 : index
    %c0_4 = arith.constant 0 : index
    %3 = vector.load %arg5[%c0_3, %c0_4] : memref<1x32xf32, #tpu.memory_space<vmem>>, vector<1x32xf32>
    %4 = vector.broadcast %3 : vector<1x32xf32> to vector<16x32xf32>
    %5 = arith.addf %2, %4 : vector<16x32xf32>
    %c0_5 = arith.constant 0 : index
    %c0_6 = arith.constant 0 : index
    %6 = vector.load %arg2[%c0_5, %c0_6] : memref<16x32xf32, #tpu.memory_space<vmem>>, vector<16x32xf32>
    %c0_7 = arith.constant 0 : index
    %c0_8 = arith.constant 0 : index
    %7 = vector.load %arg6[%c0_7, %c0_8] : memref<32x32xf32, #tpu.memory_space<vmem>>, vector<32x32xf32>
    %cst_9 = arith.constant dense<0.000000e+00> : vector<16x32xf32>
    %8 = tpu.matmul %6, %7, %cst_9 {dimension_numbers = #tpu.dot_dimension_numbers<[1], [0], [0], [1], [0, 0, 1, 1], [], []>} : vector<16x32xf32>, vector<32x32xf32>, vector<16x32xf32> -> vector<16x32xf32>
    %c0_10 = arith.constant 0 : index
    %c0_11 = arith.constant 0 : index
    %9 = vector.load %arg7[%c0_10, %c0_11] : memref<1x32xf32, #tpu.memory_space<vmem>>, vector<1x32xf32>
    %10 = vector.broadcast %9 : vector<1x32xf32> to vector<16x32xf32>
    %11 = arith.addf %8, %10 : vector<16x32xf32>
    %12 = vector.extract_strided_slice %5 {offsets = [0, 0], sizes = [8, 32], strides = [1, 1]} : vector<16x32xf32> to vector<8x32xf32>
    %13 = vector.extract_strided_slice %11 {offsets = [0, 0], sizes = [8, 32], strides = [1, 1]} : vector<16x32xf32> to vector<8x32xf32>
    %cst_12 = arith.constant dense<0.000000e+00> : vector<8x8xf32>
    %14 = tpu.matmul %12, %13, %cst_12 {dimension_numbers = #tpu.dot_dimension_numbers<[1], [1], [0], [0], [0, 0, 1, 0], [], []>} : vector<8x32xf32>, vector<8x32xf32>, vector<8x8xf32> -> vector<8x8xf32>
    %cst_13 = arith.constant dense<0xFF800000> : vector<8xf32>
    %15 = vector.multi_reduction <maximumf>, %14, %cst_13 [1] : vector<8x8xf32> to vector<8xf32>
    %16 = vector.shape_cast %15 : vector<8xf32> to vector<8x1xf32>
    %17 = vector.broadcast %16 : vector<8x1xf32> to vector<8x8xf32>
    %18 = arith.subf %14, %17 : vector<8x8xf32>
    %19 = math.exp %18 : vector<8x8xf32>
    %cst_14 = arith.constant dense<0.000000e+00> : vector<8xf32>
    %20 = vector.multi_reduction <add>, %19, %cst_14 [1] : vector<8x8xf32> to vector<8xf32>
    %21 = vector.shape_cast %20 : vector<8xf32> to vector<8x1xf32>
    %22 = tpu.reciprocal %21 {approx = true} : vector<8x1xf32> -> vector<8x1xf32>
    %23 = vector.broadcast %22 : vector<8x1xf32> to vector<8x8xf32>
    %24 = arith.mulf %19, %23 : vector<8x8xf32>
    %c0_15 = arith.constant 0 : index
    %c0_16 = arith.constant 0 : index
    %c0_17 = arith.constant 0 : index
    %25 = vector.load %arg3[%c0_15, %c0_16, %c0_17] : memref<2x8x32xf32, #tpu.memory_space<vmem>>, vector<1x8x32xf32>
    %26 = vector.shape_cast %25 : vector<1x8x32xf32> to vector<8x32xf32>
    %cst_18 = arith.constant dense<0.000000e+00> : vector<8x32xf32>
    %27 = tpu.matmul %24, %26, %cst_18 {dimension_numbers = #tpu.dot_dimension_numbers<[1], [0], [0], [1], [0, 0, 1, 1], [], []>} : vector<8x8xf32>, vector<8x32xf32>, vector<8x32xf32> -> vector<8x32xf32>
    %c0_19 = arith.constant 0 : index
    %c0_20 = arith.constant 0 : index
    %c0_21 = arith.constant 0 : index
    %28 = vector.load %arg8[%c0_19, %c0_20, %c0_21] : memref<2x8x32xf32, #tpu.memory_space<vmem>>, vector<1x8x32xf32>
    %29 = vector.shape_cast %28 : vector<1x8x32xf32> to vector<8x32xf32>
    %30 = vector.shape_cast %27 : vector<8x32xf32> to vector<1x8x32xf32>
    tpu.vector_store %arg8[%c0_19, %c0_20, %c0_21], %30 {strides = array<i32>} : memref<2x8x32xf32, #tpu.memory_space<vmem>>, vector<1x8x32xf32>,
    %c0_22 = arith.constant 0 : index
    %c0_23 = arith.constant 0 : index
    %c0_24 = arith.constant 0 : index
    %31 = vector.load %arg9[%c0_22, %c0_23, %c0_24] : memref<2x8x8xf32, #tpu.memory_space<vmem>>, vector<1x8x8xf32>
    %32 = vector.shape_cast %31 : vector<1x8x8xf32> to vector<8x8xf32>
    %33 = vector.shape_cast %24 : vector<8x8xf32> to vector<1x8x8xf32>
    tpu.vector_store %arg9[%c0_22, %c0_23, %c0_24], %33 {strides = array<i32>} : memref<2x8x8xf32, #tpu.memory_space<vmem>>, vector<1x8x8xf32>,
    %34 = vector.extract_strided_slice %5 {offsets = [8, 0], sizes = [8, 32], strides = [1, 1]} : vector<16x32xf32> to vector<8x32xf32>
    %35 = vector.extract_strided_slice %11 {offsets = [8, 0], sizes = [8, 32], strides = [1, 1]} : vector<16x32xf32> to vector<8x32xf32>
    %cst_25 = arith.constant dense<0.000000e+00> : vector<8x8xf32>
    %36 = tpu.matmul %34, %35, %cst_25 {dimension_numbers = #tpu.dot_dimension_numbers<[1], [1], [0], [0], [0, 0, 1, 0], [], []>} : vector<8x32xf32>, vector<8x32xf32>, vector<8x8xf32> -> vector<8x8xf32>
    %cst_26 = arith.constant dense<0xFF800000> : vector<8xf32>
    %37 = vector.multi_reduction <maximumf>, %36, %cst_26 [1] : vector<8x8xf32> to vector<8xf32>
    %38 = vector.shape_cast %37 : vector<8xf32> to vector<8x1xf32>
    %39 = vector.broadcast %38 : vector<8x1xf32> to vector<8x8xf32>
    %40 = arith.subf %36, %39 : vector<8x8xf32>
    %41 = math.exp %40 : vector<8x8xf32>
    %cst_27 = arith.constant dense<0.000000e+00> : vector<8xf32>
    %42 = vector.multi_reduction <add>, %41, %cst_27 [1] : vector<8x8xf32> to vector<8xf32>
    %43 = vector.shape_cast %42 : vector<8xf32> to vector<8x1xf32>
    %44 = tpu.reciprocal %43 {approx = true} : vector<8x1xf32> -> vector<8x1xf32>
    %45 = vector.broadcast %44 : vector<8x1xf32> to vector<8x8xf32>
    %46 = arith.mulf %41, %45 : vector<8x8xf32>
    %c1 = arith.constant 1 : index
    %c0_28 = arith.constant 0 : index
    %c0_29 = arith.constant 0 : index
    %47 = vector.load %arg3[%c1, %c0_28, %c0_29] : memref<2x8x32xf32, #tpu.memory_space<vmem>>, vector<1x8x32xf32>
    %48 = vector.shape_cast %47 : vector<1x8x32xf32> to vector<8x32xf32>
    %cst_30 = arith.constant dense<0.000000e+00> : vector<8x32xf32>
    %49 = tpu.matmul %46, %48, %cst_30 {dimension_numbers = #tpu.dot_dimension_numbers<[1], [0], [0], [1], [0, 0, 1, 1], [], []>} : vector<8x8xf32>, vector<8x32xf32>, vector<8x32xf32> -> vector<8x32xf32>
    %c1_31 = arith.constant 1 : index
    %c0_32 = arith.constant 0 : index
    %c0_33 = arith.constant 0 : index
    %50 = vector.load %arg8[%c1_31, %c0_32, %c0_33] : memref<2x8x32xf32, #tpu.memory_space<vmem>>, vector<1x8x32xf32>
    %51 = vector.shape_cast %50 : vector<1x8x32xf32> to vector<8x32xf32>
    %52 = vector.shape_cast %49 : vector<8x32xf32> to vector<1x8x32xf32>
    tpu.vector_store %arg8[%c1_31, %c0_32, %c0_33], %52 {strides = array<i32>} : memref<2x8x32xf32, #tpu.memory_space<vmem>>, vector<1x8x32xf32>,
    %c1_34 = arith.constant 1 : index
    %c0_35 = arith.constant 0 : index
    %c0_36 = arith.constant 0 : index
    %53 = vector.load %arg9[%c1_34, %c0_35, %c0_36] : memref<2x8x8xf32, #tpu.memory_space<vmem>>, vector<1x8x8xf32>
    %54 = vector.shape_cast %53 : vector<1x8x8xf32> to vector<8x8xf32>
    %55 = vector.shape_cast %46 : vector<8x8xf32> to vector<1x8x8xf32>
    tpu.vector_store %arg9[%c1_34, %c0_35, %c0_36], %55 {strides = array<i32>} : memref<2x8x8xf32, #tpu.memory_space<vmem>>, vector<1x8x8xf32>,
    return
  }
  func.func @transform_0(%arg0: i32) -> (i32, i32) {
    %c0_i32 = arith.constant 0 : i32
    %c0_i32_0 = arith.constant 0 : i32
    %c0_i32_1 = arith.constant 0 : i32
    return %c0_i32, %c0_i32_0 : i32, i32
  }
  func.func @transform_1(%arg0: i32) -> (i32, i32) {
    %c0_i32 = arith.constant 0 : i32
    %c0_i32_0 = arith.constant 0 : i32
    %c0_i32_1 = arith.constant 0 : i32
    return %c0_i32, %c0_i32_0 : i32, i32
  }
  func.func @transform_2(%arg0: i32) -> (i32, i32, i32) {
    %c0_i32 = arith.constant 0 : i32
    %c0_i32_0 = arith.constant 0 : i32
    %c0_i32_1 = arith.constant 0 : i32
    %c0_i32_2 = arith.constant 0 : i32
    return %c0_i32, %c0_i32_0, %c0_i32_1 : i32, i32, i32
  }
  func.func @transform_3(%arg0: i32) -> (i32, i32) {
    %c0_i32 = arith.constant 0 : i32
    %c0_i32_0 = arith.constant 0 : i32
    %c0_i32_1 = arith.constant 0 : i32
    return %c0_i32, %c0_i32_0 : i32, i32
  }
  func.func @transform_4(%arg0: i32) -> (i32, i32) {
    %c0_i32 = arith.constant 0 : i32
    %c0_i32_0 = arith.constant 0 : i32
    %c0_i32_1 = arith.constant 0 : i32
    return %c0_i32, %c0_i32_0 : i32, i32
  }
  func.func @transform_5(%arg0: i32) -> (i32, i32) {
    %c0_i32 = arith.constant 0 : i32
    %c0_i32_0 = arith.constant 0 : i32
    %c0_i32_1 = arith.constant 0 : i32
    return %c0_i32, %c0_i32_0 : i32, i32
  }
  func.func @transform_6(%arg0: i32) -> (i32, i32) {
    %c0_i32 = arith.constant 0 : i32
    %c0_i32_0 = arith.constant 0 : i32
    %c0_i32_1 = arith.constant 0 : i32
    return %c0_i32, %c0_i32_0 : i32, i32
  }
  func.func @transform_7(%arg0: i32) -> (i32, i32, i32) {
    %c0_i32 = arith.constant 0 : i32
    %c0_i32_0 = arith.constant 0 : i32
    %c0_i32_1 = arith.constant 0 : i32
    %c0_i32_2 = arith.constant 0 : i32
    return %c0_i32, %c0_i32_0, %c0_i32_1 : i32, i32, i32
  }
  func.func @transform_8(%arg0: i32) -> (i32, i32, i32) {
    %c0_i32 = arith.constant 0 : i32
    %c0_i32_0 = arith.constant 0 : i32
    %c0_i32_1 = arith.constant 0 : i32
    %c0_i32_2 = arith.constant 0 : i32
    return %c0_i32, %c0_i32_0, %c0_i32_1 : i32, i32, i32
  }
}

</mosaic_0001>

<bundles_post_ra>
// kernel: tpu_custom_call.1
= control target key start
LH: loop header
LB: loop body
LE: loop exit
PB: predicated region body
PF: predicated region fallthrough
CT: control target
= control target key end

     0   :  { %14 = vsyncpa [#allocation3], 0  ;;  %s1021_s0 = inlined_call_operand.hbm [shape: f32[16,32], index: 0, kind: input, shape index: {}]   ;;  %s1022_s1 = inlined_call_operand.hbm [shape: f32[16,32], index: 1, kind: input, shape index: {}]   ;;  %s1023_s2 = inlined_call_operand.hbm [shape: f32[2,8,32], index: 2, kind: input, shape index: {}]   ;;  %s1024_s3 = inlined_call_operand.hbm [shape: f32[32,32], index: 3, kind: input, shape index: {}]   ;;  %s1025_s4 = inlined_call_operand.vmem [shape: f32[1,32], index: 4, kind: input, shape index: {}]   ;;  %s1026_s5 = inlined_call_operand.hbm [shape: f32[32,32], index: 5, kind: input, shape index: {}]   ;;  %s1027_s6 = inlined_call_operand.vmem [shape: f32[1,32], index: 6, kind: input, shape index: {}]   ;;  %s1028_s7 = inlined_call_operand.hbm [shape: f32[2,8,32], index: 7, kind: output, shape index: {0}]   ;;  %s1029_s8 = inlined_call_operand.hbm [shape: f32[2,8,8], index: 8, kind: output, shape index: {1}]  }
   0x1   :  { %15 = vsyncpa [#allocation6], 0 }
   0x2   :  { %16 = vsyncpa [#allocation9], 0 }
   0x3   :  { %17 = vsyncpa [#allocation4], 0 }
   0x4   :  { %18 = vsyncpa [#allocation13], 0  ;;  %s895_s27 = smov [#allocation5]   ;;  %s896_s29 = smov [#allocation8]  }
   0x5   :  { %s36_s28 = sshll.u32 %s895_s27, 4  ;;  %s60_s30 = sshll.u32 %s896_s29, 4  ;;  %s37_s28 = int_to_ptr.vmem [resolvable:$true] %s36_s28  ;;  %s61_s30 = int_to_ptr.vmem [resolvable:$true] %s60_s30 }
   0x6   :  { %s753_s9 = scalar_lea.vmem %s37_s28, 256  ;;  %p758_p1 = scmp.lt.s32.totalorder %s37_s28, %s37_s28 }
   0x7   :  { %p754_p0 = scmp.ne.s32.totalorder %s37_s28, %s753_s9  ;;  %p759_p2 = scmp.lt.s32.totalorder %s753_s9, %s753_s9 }
   0x9   :  { %p760_p3 = por %p759_p2, %p758_p1 }
   0xb   :  { %p761_p4 = pnand %p760_p3, %p754_p0 }
   0xd   :  { %764 = shalt.err (!%p761_p4)
}
   0xe   :  { %s897_s10 = smov 128   ;;  %s898_s11 = smov 8  }
   0xf   :  { %42 = dma.hbm_to_vmem [thread:$0]  %s1022_s1, 256, %s37_s28, [#allocation6], %s897_s10, %s897_s10, %s898_s11  }
  0x10   :  { %s773_s14 = scalar_lea.vmem %s61_s30, 512  ;;  %p778_p6 = scmp.lt.s32.totalorder %s61_s30, %s61_s30 }
  0x11   :  { %p774_p5 = scmp.ne.s32.totalorder %s61_s30, %s773_s14  ;;  %p779_p7 = scmp.lt.s32.totalorder %s773_s14, %s773_s14 }
  0x13   :  { %p780_p8 = por %p779_p7, %p778_p6 }
  0x15   :  { %p781_p9 = pnand %p780_p8, %p774_p5 }
  0x17   :  { %784 = shalt.err (!%p781_p9)
}
  0x18   :  { %66 = dma.hbm_to_vmem [thread:$0]  %s1024_s3, 512, %s61_s30, [#allocation9], %s897_s10, %s897_s10, %s898_s11  }
  0x19   :  { %s899_s17 = smov [#allocation2]   ;;  %s900_s19 = smov [#allocation7]  }
  0x1a   :  { %s24_s18 = sshll.u32 %s899_s17, 4  ;;  %s48_s20 = sshll.u32 %s900_s19, 4  ;;  %s25_s18 = int_to_ptr.vmem [resolvable:$true] %s24_s18  ;;  %s49_s20 = int_to_ptr.vmem [resolvable:$true] %s48_s20 }
  0x1b   :  { %s793_s1 = scalar_lea.vmem %s25_s18, 256  ;;  %p798_p11 = scmp.lt.s32.totalorder %s25_s18, %s25_s18 }
  0x1c   :  { %p794_p10 = scmp.ne.s32.totalorder %s25_s18, %s793_s1  ;;  %p799_p12 = scmp.lt.s32.totalorder %s793_s1, %s793_s1 }
  0x1e   :  { %p800_p13 = por %p799_p12, %p798_p11 }
  0x20   :  { %p801_p0 = pnand %p800_p13, %p794_p10 }
  0x22   :  { %804 = shalt.err (!%p801_p0)
}
  0x23   :  { %30 = dma.hbm_to_vmem [thread:$0]  %s1021_s0, 256, %s25_s18, [#allocation3], %s897_s10, %s897_s10, %s898_s11  }
  0x24   :  { %s813_s3 = scalar_lea.vmem %s49_s20, 256  ;;  %p818_p2 = scmp.lt.s32.totalorder %s49_s20, %s49_s20 }
  0x25   :  { %p814_p1 = scmp.ne.s32.totalorder %s49_s20, %s813_s3  ;;  %p819_p3 = scmp.lt.s32.totalorder %s813_s3, %s813_s3 }
  0x27   :  { %p820_p4 = por %p819_p3, %p818_p2 }
  0x29   :  { %p821_p5 = pnand %p820_p4, %p814_p1 }
  0x2b   :  { %824 = shalt.err (!%p821_p5)
}
  0x2c   :  { %54 = dma.hbm_to_vmem [thread:$0]  %s1023_s2, 256, %s49_s20, [#allocation6], %s897_s10, %s897_s10, %s898_s11  }
  0x2d   :  { %s901_s25 = smov [#allocation10]  }
  0x2e   :  { %s74_s26 = sshll.u32 %s901_s25, 4  ;;  %s75_s26 = int_to_ptr.vmem [resolvable:$true] %s74_s26 }
  0x2f   :  { %s833_s27 = scalar_lea.vmem %s75_s26, 512  ;;  %p838_p7 = scmp.lt.s32.totalorder %s75_s26, %s75_s26 }
  0x30   :  { %p834_p6 = scmp.ne.s32.totalorder %s75_s26, %s833_s27  ;;  %p839_p8 = scmp.lt.s32.totalorder %s833_s27, %s833_s27 }
  0x32   :  { %p840_p9 = por %p839_p8, %p838_p7 }
  0x34   :  { %p841_p10 = pnand %p840_p9, %p834_p6 }
  0x36   :  { %844 = shalt.err (!%p841_p10)
}
  0x37   :  { %80 = dma.hbm_to_vmem [thread:$0]  %s1026_s5, 512, %s75_s26, [#allocation9], %s897_s10, %s897_s10, %s898_s11  }
  0x38   :  { %885 = dma.done.wait [#allocation3], 256  }
  0x39   :  { %886 = vsyncadd [#allocation3], 4294967040 }
  0x3a   :  { %887 = dma.done.wait [#allocation6], 512  }
  0x3b   :  { %888 = vsyncadd [#allocation6], 4294966784 }
  0x3c   :  { %889 = dma.done.wait [#allocation9], 1024  }
  0x3d   :  { %890 = vsyncadd [#allocation9], 4294966272  ;;  %v198_v0 = vld [vmem:[#allocation10 + $0x18] sm:$0xff]  ;;  %v197_v2 = vld [vmem:[#allocation10 + $0x10] sm:$0xff]  ;;  %vm111_vm0 = vcmask 261120   ;;  %v902_v12 = vmov 0.0  }
  0x3e   :  { %v103_v1 = vld [vmem:[#allocation8 + $0x18] sm:$0xff]  ;;  %695 = vmatprep.subr.mxu1 %v198_v0  ;;  %v102_v3 = vld [vmem:[#allocation8 + $0x10] sm:$0xff]  ;;  %v196_v4 = vld [vmem:[#allocation10 + $0x8] sm:$0xff]  ;;  %vm903_vm1 = vmmov 0   ;;  %vm363_vm2 = vcmask 64512  }
  0x3f   :  { %684 = vmatprep.subr.mxu0 %v103_v1  ;;  %696 = vmatpush3.msra.mxu1 %v198_v0  ;;  %v101_v5 = vld [vmem:[#allocation8 + $0x8] sm:$0xff]  ;;  %v195_v6 = vld [vmem:[#allocation10] sm:$0xff]  ;;  %v98_v10 = vld [vmem:[#allocation2] sm:$0xff] }
  0x40   :  { %685 = vmatpush3.msra.mxu0 %v103_v1  ;;  %697 = vmatprep.subr.mxu1 %v197_v2  ;;  %v193_v7 = vld [vmem:[#allocation5] sm:$0xff]  ;;  %v194_v9 = vld [vmem:[#allocation5 + $0x8] sm:$0xff]  ;;  %v99_v11 = vld [vmem:[#allocation2 + $0x8] sm:$0xff] }
  0x41   :  { %686 = vmatprep.subr.mxu0 %v102_v3  ;;  %698 = vmatpush3.msra.mxu1 %v197_v2  ;;  %v100_v8 = vld [vmem:[#allocation8] sm:$0xff]  ;;  %v655_v14 = vld [vmem:[%s1027_s6] ss:$0 sm:$0xff]  ;;  %v539_v44 = vld [vmem:[#allocation7 + $0x8] sm:$0xff] }
  0x42   :  { %687 = vmatpush3.msra.mxu0 %v102_v3  ;;  %699 = vmatprep.subr.mxu1 %v196_v4  ;;  %v652_v17 = vld [vmem:[%s1025_s4] ss:$0 sm:$0xff]  ;;  %s904_s4 = smov [#allocation12]  }
  0x43   :  { %688 = vmatprep.subr.mxu0 %v101_v5  ;;  %700 = vmatpush3.msra.mxu1 %v196_v4  ;;  %v375_v39 = vld [vmem:[#allocation7] sm:$0xff]  ;;  %s634_s6 = sshll.u32 %s904_s4, 4  ;;  %s635_s6 = int_to_ptr.vmem [resolvable:$true] %s634_s6 }
  0x44   :  { %689 = vmatpush3.msra.mxu0 %v101_v5  ;;  %701 = vmatprep.subr.mxu1 %v195_v6  ;;  %s845_s9 = scalar_lea.vmem %s635_s6, 256  ;;  %p850_p12 = scmp.lt.s32.totalorder %s635_s6, %s635_s6 }
  0x45   :  { %703 = vmatprep.mubr.msk.f32.mxu1 %vm111_vm0, %v193_v7  ;;  %702 = vmatpush3.msra.mxu1 %v195_v6  ;;  %p846_p11 = scmp.ne.s32.totalorder %s635_s6, %s845_s9  ;;  %p851_p13 = scmp.lt.s32.totalorder %s845_s9, %s845_s9 }
  0x46   :  { %690 = vmatprep.subr.mxu0 %v100_v8  ;;  %704 = vmatmul.mubr.msk.f32.vlgmr.msra.gmra.mxu1 %vm111_vm0, %v194_v9 }
  0x47   :  { %691 = vmatpush3.msra.mxu0 %v100_v8  ;;  %692 = vmatprep.mubr.msk.f32.mxu0 %vm111_vm0, %v98_v10  ;;  %p852_p0 = por %p851_p13, %p850_p12 }
  0x48   :  { %693 = vmatmul.mubr.msk.f32.vlgmr.msra.gmra.mxu0 %vm111_vm0, %v99_v11  ;;  %706 = vmatprep.subr.mxu0 %v902_v12 }
  0x49   :  { %711 = vmatprep.subr.mxu1 %v902_v12  ;;  %708 = vmatprep.mubr.msk.f32.mxu0 %vm903_vm1, %v902_v12  ;;  %p853_p1 = pnand %p852_p0, %p846_p11 }
  0x4a   :  { %713 = vmatprep.mubr.msk.f32.mxu1 %vm903_vm1, %v902_v12  ;;  %712 = vmatpush3.msra.mxu1 %v375_v39 }
  0x4b   :  { %721 = vmatprep.subr.mxu1 %v902_v12 }
 0x106   :  { %v705_v13 = vpop.f32.mrf.mxu1 }
 0x107   :  { %v284_v21 = vadd.f32 %v705_v13, %v655_v14 }
 0x108   :  { %v694_v15 = vpop.f32.mrf.mxu0  ;;  %v278_v16 = vpop.f32.mrf.mxu1 }
 0x109   :  { %v279_v18 = vadd.f32 %v655_v14, %v278_v16  ;;  %v190_v22 = vadd.f32 %v694_v15, %v652_v17 }
 0x10a   :  { %v184_v19 = vpop.f32.mrf.mxu0 }
 0x10b   :  { %707 = vmatpush3.xpose.msk.msra.mxu0 %vm111_vm0, %v279_v18  ;;  %v185_v20 = vadd.f32 %v652_v17, %v184_v19 }
 0x10c   :  { %716 = vmatprep.subr.mxu0 %v902_v12 }
 0x10e   :  { %709 = vmatmul.mubr.msk.f32.vlgmr.msra.gmra.mxu0 %vm111_vm0, %v185_v20 }
 0x10f   :  { %717 = vmatpush3.xpose.msk.msra.mxu0 %vm111_vm0, %v284_v21  ;;  %718 = vmatprep.mubr.msk.f32.mxu0 %vm903_vm1, %v902_v12 }
 0x112   :  { %719 = vmatmul.mubr.msk.f32.vlgmr.msra.gmra.mxu0 %vm111_vm0, %v190_v22 }
 0x1ce   :  { %v359_v23 = vpop.f32.mrf.mxu0 }
 0x1cf   :  { %v364_v24 = vsel %vm363_vm2, %v359_v23, -inf }
 0x1d0   :  { %365 = vmax.xlane.f32.xlu0 %v364_v24  ;;  %v710_v25 = vpop.f32.mrf.mxu0 }
 0x1d2   :  { %v523_v26 = vpop.f32.mrf.mxu0 }
 0x1d3   :  { %v527_v27 = vsel %vm363_vm2, %v523_v26, -inf }
 0x1d4   :  { %528 = vmax.xlane.f32.xlu0 %v527_v27  ;;  %v720_v28 = vpop.f32.mrf.mxu0 }
 0x259   :  { %v366_v29 = vpop.xlane.xlu0 %365 }
 0x25a   :  { %v367_v30 = vsub.f32 %v359_v23, %v366_v29 }
 0x25c   :  { %v368_v31 = vmul.f32 1.442695, %v367_v30 }
 0x25d   :  { %v529_v32 = vpop.xlane.xlu0 %528 }
 0x25e   :  { %737 = vpow2.f32 %v368_v31  ;;  %v530_v33 = vsub.f32 %v523_v26, %v529_v32 }
 0x260   :  { %v531_v34 = vmul.f32 1.442695, %v530_v33 }
 0x262   :  { %739 = vpow2.f32 %v531_v34 }
 0x26b   :  { %v738_v35 = vpop.eup %737 }
 0x26c   :  { %v370_v36 = vsel %vm363_vm2, %v738_v35, 0.0 }
 0x26d   :  { %371 = vadd.xlane.f32.xlu1 %v370_v36 }
 0x26f   :  { %v740_v37 = vpop.eup %739 }
 0x270   :  { %v533_v38 = vsel %vm363_vm2, %v740_v37, 0.0 }
 0x271   :  { %534 = vadd.xlane.f32.xlu1 %v533_v38 }
 0x2f6   :  { %v372_v40 = vpop.xlane.xlu1 %371 }
 0x2f7   :  { %741 = vrcp.f32 %v372_v40 }
 0x2fa   :  { %v535_v41 = vpop.xlane.xlu1 %534 }
 0x2fb   :  { %743 = vrcp.f32 %v535_v41 }
 0x304   :  { %v742_v42 = vpop.eup %741 }
 0x305   :  { %v374_v43 = vmul.f32 %v742_v42, %v738_v35 }
 0x307   :  { %714 = vmatmul.mubr.msk.f32.vlgmr.msra.gmra.mxu1 %vm363_vm2, %v374_v43  ;;  %450 = vst.msk [vmem:[#allocation12] sm:$0xff] %vm363_vm2, %v374_v43 }
 0x308   :  { %v744_v45 = vpop.eup %743  ;;  %722 = vmatpush3.msra.mxu1 %v539_v44  ;;  %723 = vmatprep.mubr.msk.f32.mxu1 %vm903_vm1, %v902_v12 }
 0x309   :  { %v537_v46 = vmul.f32 %v744_v45, %v740_v37 }
 0x30b   :  { %724 = vmatmul.mubr.msk.f32.vlgmr.msra.gmra.mxu1 %vm363_vm2, %v537_v46  ;;  %616 = vst.msk [vmem:[#allocation12 + $0x8] sm:$0xff] %vm363_vm2, %v537_v46 }
 0x30c   :  { %856 = shalt.err (!%p853_p1)
}
 0x30d   :  { %640 = dma.vmem_to_hbm [thread:$0]  %s635_s6, 256, %s1029_s8, [#allocation13], %s897_s10, %s897_s10, %s898_s11  }
 0x30e   :  { %s905_s14 = smov [#allocation11]  }
 0x30f   :  { %s622_s15 = sshll.u32 %s905_s14, 4  ;;  %s623_s15 = int_to_ptr.vmem [resolvable:$true] %s622_s15 }
 0x310   :  { %s865_s16 = scalar_lea.vmem %s623_s15, 256  ;;  %p870_p3 = scmp.lt.s32.totalorder %s623_s15, %s623_s15 }
 0x311   :  { %p866_p2 = scmp.ne.s32.totalorder %s623_s15, %s865_s16  ;;  %p871_p4 = scmp.lt.s32.totalorder %s865_s16, %s865_s16 }
 0x313   :  { %p872_p5 = por %p871_p4, %p870_p3 }
 0x315   :  { %p873_p6 = pnand %p872_p5, %p866_p2 }
 0x3c7   :  { %v445_v47 = vpop.f32.mrf.mxu1 }
 0x3c8   :  { %449 = vst.msk [vmem:[#allocation11] sm:$0xff] %vm111_vm0, %v445_v47 }
 0x3c9   :  { %v715_v48 = vpop.f32.mrf.mxu1 }
 0x3cb   :  { %v609_v49 = vpop.f32.mrf.mxu1 }
 0x3cc   :  { %614 = vst.msk [vmem:[#allocation11 + $0x8] sm:$0xff] %vm111_vm0, %v609_v49 }
 0x3cd   :  { %v725_v50 = vpop.f32.mrf.mxu1 }
 0x3ce   :  { %876 = shalt.err (!%p873_p6)
}
 0x3cf   :  { %628 = dma.vmem_to_hbm [thread:$0]  %s623_s15, 256, %s1028_s7, [#allocation4], %s897_s10, %s897_s10, %s898_s11  }
 0x3d0   :  { %891 = dma.done.wait [#allocation4], 256  }
 0x3d1   :  { %892 = vsyncadd [#allocation4], 4294967040 }
 0x3d2   :  { %893 = dma.done.wait [#allocation13], 256  }
 0x3d3   :  { %894 = vsyncadd [#allocation13], 4294967040 }
 0x3d4   :  { %647 = vsyncpa [#allocation3], 1 }
 0x3d5   :  { %648 = vsyncpa [#allocation6], 1 }
 0x3d6   :  { %649 = vsyncpa [#allocation9], 1 }
 0x3d7   :  { %650 = vsyncpa [#allocation4], 1 }
 0x3d8   :  { %651 = vsyncpa [#allocation13], 1 }

</bundles_post_ra>
